<compile_context>
chip_gen: v7x
topology: tpu7x:2x2x1
jax: 0.10.0
libtpu: 0.0.40
codegen_flags: <defaults>
</compile_context>

<pallas_src>
import jax
import jax.numpy as jnp
from jax.experimental import pallas as pl
from jax.experimental.pallas import tpu as pltpu


_LANES = 512          # lane-tile width (multiple of 128)
_MAX_BLOCK_ROWS = 256  # (3, 256, 512) f32 = 1.5 MiB per in/out block


def _choose_block_rows(m):
    """Pick the sublane-row tile: 8-aligned, <=256 rows, aiming for >=4 grid steps."""
    if m <= 8:
        return m                      # full extent (tiny clouds; latency-bound anyway)
    target = (m + 3) // 4             # ~4 grid steps when possible (v7x megacore)
    target = ((target + 7) // 8) * 8  # keep sublane-dense blocks
    return max(8, min(_MAX_BLOCK_ROWS, target))


# ----------------------------------------------------------------------------
# Kernel.
#   quat_ref  : (4,) f32 in SMEM  = (r, i, j, k)
#   trans_ref : (3,) f32 in SMEM  = (t0, t1, t2)
#   x_ref     : (3, R, L) dense coordinate planes (x, y, z)
#   o_ref     : (3, R, L) transformed planes
# ----------------------------------------------------------------------------
def _align_kernel(quat_ref, trans_ref, x_ref, o_ref):
    # Quaternion -> rotation matrix (pytorch3d semantics, incl. 2/|q|^2 norm),
    # computed once per grid step on the scalar unit from SMEM scalars.
    qr = quat_ref[0]
    qi = quat_ref[1]
    qj = quat_ref[2]
    qk = quat_ref[3]
    two_s = 2.0 / (qr * qr + qi * qi + qj * qj + qk * qk)

    r00 = 1.0 - two_s * (qj * qj + qk * qk)
    r01 = two_s * (qi * qj - qk * qr)
    r02 = two_s * (qi * qk + qj * qr)
    r10 = two_s * (qi * qj + qk * qr)
    r11 = 1.0 - two_s * (qi * qi + qk * qk)
    r12 = two_s * (qj * qk - qi * qr)
    r20 = two_s * (qi * qk - qj * qr)
    r21 = two_s * (qj * qk + qi * qr)
    r22 = 1.0 - two_s * (qi * qi + qj * qj)

    t0 = trans_ref[0]
    t1 = trans_ref[1]
    t2 = trans_ref[2]

    # Fully dense (R, L) coordinate planes.
    x0 = x_ref[0]
    x1 = x_ref[1]
    x2 = x_ref[2]

    # out_c = R[c,0]*x + R[c,1]*y + R[c,2]*z + t[c]   (pure VPU scalar-FMAs)
    # Each plane is written with a single full-block dense store.
    o_ref[0] = r00 * x0 + r01 * x1 + r02 * x2 + t0
    o_ref[1] = r10 * x0 + r11 * x1 + r12 * x2 + t1
    o_ref[2] = r20 * x0 + r21 * x1 + r22 * x2 + t2


def _point_cloud_alignment_impl(p1, quat, translation):
    """Forward pass of PointCloudAlignment.

    p1:          (N, 3) float32 points
    quat:        (4,)   float32 quaternion parameter
    translation: (3,)   float32 translation parameter
    returns:     (N, 3) float32  (p1 @ R^T + t)
    """
    p1 = p1.astype(jnp.float32)
    quat = quat.astype(jnp.float32)
    translation = translation.astype(jnp.float32)

    n = p1.shape[0]
    m = (n + _LANES - 1) // _LANES          # number of 512-point lane rows
    n_pad = m * _LANES
    block_rows = _choose_block_rows(m)
    grid = ((m + block_rows - 1) // block_rows,)

    # SoA, lane- and sublane-dense view: (3, m, LANES).
    # transpose + pad fuse into one XLA copy under jit; the reshape is free.
    x = p1.T
    if n_pad != n:
        x = jnp.pad(x, ((0, 0), (0, n_pad - n)))
    x = x.reshape(3, m, _LANES)

    out = pl.pallas_call(
        _align_kernel,
        out_shape=jax.ShapeDtypeStruct((3, m, _LANES), jnp.float32),
        grid_spec=pltpu.PrefetchScalarGridSpec(
            num_scalar_prefetch=0,
            grid=grid,
            in_specs=[
                # 7 transform scalars, resident in SMEM (no params HBM traffic).
                pl.BlockSpec(memory_space=pltpu.MemorySpace.SMEM),
                pl.BlockSpec(memory_space=pltpu.MemorySpace.SMEM),
                # Dense coordinate-plane tile.
                pl.BlockSpec((3, block_rows, _LANES), lambda i: (0, i, 0)),
            ],
            out_specs=pl.BlockSpec((3, block_rows, _LANES), lambda i: (0, i, 0)),
        ),
        compiler_params=pltpu.CompilerParams(
            dimension_semantics=("parallel",),
        ),
    )(quat, translation, x)

    # Back to the module's (N, 3) AoS layout; slice + transpose fuse under jit.
    return out.reshape(3, n_pad)[:, :n].T


point_cloud_alignment = jax.jit(_point_cloud_alignment_impl)


# ----------------------------------------------------------------------------
# Plain-JAX reference for sanity checking (pytorch3d quaternion_to_matrix).
# ----------------------------------------------------------------------------
def quaternion_to_matrix(q):
    r, i, j, k = q[0], q[1], q[2], q[3]
    two_s = 2.0 / jnp.sum(q * q)
    return jnp.stack(
        [
            jnp.stack([1 - two_s * (j * j + k * k), two_s * (i * j - k * r), two_s * (i * k + j * r)]),
            jnp.stack([two_s * (i * j + k * r), 1 - two_s * (i * i + k * k), two_s * (j * k - i * r)]),
            jnp.stack([two_s * (i * k - j * r), two_s * (j * k + i * r), 1 - two_s * (i * i + j * j)]),
        ],
        axis=0,
    ).astype(jnp.float32)


def point_cloud_alignment_ref(p1, quat, translation):
    rotation = quaternion_to_matrix(quat.astype(jnp.float32))
    return (
        jnp.dot(p1.astype(jnp.float32), rotation.T, precision=jax.lax.Precision.HIGHEST)
        + translation.astype(jnp.float32)
    )


if __name__ == "__main__":
    key = jax.random.PRNGKey(0)
    k_pts, k_quat, k_trans, k_pts2 = jax.random.split(key, 4)

    # The nn.Module __init__ uses quat=[1,0,0,0], translation=zeros(3); perturb
    # them so the rotate+translate path (and the |q|^2 normalization) is exercised.
    quat = jnp.array([1.0, 0.0, 0.0, 0.0], jnp.float32) + 0.1 * jax.random.normal(k_quat, (4,), jnp.float32)
    translation = 0.5 * jax.random.normal(k_trans, (3,), jnp.float32)

    # Case 1: small cloud, N far from a multiple of 512 (single ragged block).
    N1 = 200
    p1_small = jax.random.normal(k_pts, (N1, 3), dtype=jnp.float32)
    out1 = jax.block_until_ready(point_cloud_alignment(p1_small, quat, translation))
    ref1 = point_cloud_alignment_ref(p1_small, quat, translation)
    assert out1.shape == (N1, 3) and out1.dtype == jnp.float32
    assert jnp.allclose(out1, ref1, atol=1e-5, rtol=1e-5), "mismatch vs reference (small)"

    # Case 2: multi-block cloud with a ragged last row-block (exercises the grid).
    N2 = 33000
    p1_big = jax.random.normal(k_pts2, (N2, 3), dtype=jnp.float32)
    out2 = jax.block_until_ready(point_cloud_alignment(p1_big, quat, translation))
    ref2 = point_cloud_alignment_ref(p1_big, quat, translation)
    assert out2.shape == (N2, 3) and out2.dtype == jnp.float32
    assert jnp.allclose(out2, ref2, atol=1e-5, rtol=1e-5), "mismatch vs reference (big)"

    print("KERNEL_OK")
</pallas_src>

<mosaic_0001>
module attributes {stable_mosaic.version = 11 : i64} {
  func.func @_align_kernel(%arg0: i32, %arg1: memref<4xf32, #tpu.memory_space<smem>>, %arg2: memref<3xf32, #tpu.memory_space<smem>>, %arg3: memref<3x1x512xf32, #tpu.memory_space<vmem>>, %arg4: memref<3x1x512xf32, #tpu.memory_space<vmem>>) attributes {dimension_semantics = [#tpu.dimension_semantics<parallel>], iteration_bounds = array<i64: 1>, scalar_prefetch = 0 : i64, scratch_operands = 0 : i64, tpu.core_type = #tpu.core_type<tc>, window_params = [{transform_indices = @transform_0, window_bounds = array<i64: 4>}, {transform_indices = @transform_1, window_bounds = array<i64: 3>}, {transform_indices = @transform_2, window_bounds = array<i64: 3, 1, 512>}, {transform_indices = @transform_3, window_bounds = array<i64: 3, 1, 512>}]} {
    %c0 = arith.constant 0 : index
    %0 = memref.load %arg1[%c0] : memref<4xf32, #tpu.memory_space<smem>>
    %c1 = arith.constant 1 : index
    %1 = memref.load %arg1[%c1] : memref<4xf32, #tpu.memory_space<smem>>
    %c2 = arith.constant 2 : index
    %2 = memref.load %arg1[%c2] : memref<4xf32, #tpu.memory_space<smem>>
    %c3 = arith.constant 3 : index
    %3 = memref.load %arg1[%c3] : memref<4xf32, #tpu.memory_space<smem>>
    %4 = arith.mulf %0, %0 : f32
    %5 = arith.mulf %1, %1 : f32
    %6 = arith.addf %4, %5 : f32
    %7 = arith.mulf %2, %2 : f32
    %8 = arith.addf %6, %7 : f32
    %9 = arith.mulf %3, %3 : f32
    %10 = arith.addf %8, %9 : f32
    %cst = arith.constant 2.000000e+00 : f32
    %11 = arith.divf %cst, %10 : f32
    %12 = arith.mulf %2, %2 : f32
    %13 = arith.mulf %3, %3 : f32
    %14 = arith.addf %12, %13 : f32
    %15 = arith.mulf %11, %14 : f32
    %cst_0 = arith.constant 1.000000e+00 : f32
    %16 = arith.subf %cst_0, %15 : f32
    %17 = arith.mulf %1, %2 : f32
    %18 = arith.mulf %3, %0 : f32
    %19 = arith.subf %17, %18 : f32
    %20 = arith.mulf %11, %19 : f32
    %21 = arith.mulf %1, %3 : f32
    %22 = arith.mulf %2, %0 : f32
    %23 = arith.addf %21, %22 : f32
    %24 = arith.mulf %11, %23 : f32
    %25 = arith.mulf %1, %2 : f32
    %26 = arith.mulf %3, %0 : f32
    %27 = arith.addf %25, %26 : f32
    %28 = arith.mulf %11, %27 : f32
    %29 = arith.mulf %1, %1 : f32
    %30 = arith.mulf %3, %3 : f32
    %31 = arith.addf %29, %30 : f32
    %32 = arith.mulf %11, %31 : f32
    %cst_1 = arith.constant 1.000000e+00 : f32
    %33 = arith.subf %cst_1, %32 : f32
    %34 = arith.mulf %2, %3 : f32
    %35 = arith.mulf %1, %0 : f32
    %36 = arith.subf %34, %35 : f32
    %37 = arith.mulf %11, %36 : f32
    %38 = arith.mulf %1, %3 : f32
    %39 = arith.mulf %2, %0 : f32
    %40 = arith.subf %38, %39 : f32
    %41 = arith.mulf %11, %40 : f32
    %42 = arith.mulf %2, %3 : f32
    %43 = arith.mulf %1, %0 : f32
    %44 = arith.addf %42, %43 : f32
    %45 = arith.mulf %11, %44 : f32
    %46 = arith.mulf %1, %1 : f32
    %47 = arith.mulf %2, %2 : f32
    %48 = arith.addf %46, %47 : f32
    %49 = arith.mulf %11, %48 : f32
    %cst_2 = arith.constant 1.000000e+00 : f32
    %50 = arith.subf %cst_2, %49 : f32
    %c0_3 = arith.constant 0 : index
    %51 = memref.load %arg2[%c0_3] : memref<3xf32, #tpu.memory_space<smem>>
    %c1_4 = arith.constant 1 : index
    %52 = memref.load %arg2[%c1_4] : memref<3xf32, #tpu.memory_space<smem>>
    %c2_5 = arith.constant 2 : index
    %53 = memref.load %arg2[%c2_5] : memref<3xf32, #tpu.memory_space<smem>>
    %c0_6 = arith.constant 0 : index
    %c0_7 = arith.constant 0 : index
    %c0_8 = arith.constant 0 : index
    %54 = vector.load %arg3[%c0_6, %c0_7, %c0_8] : memref<3x1x512xf32, #tpu.memory_space<vmem>>, vector<1x1x512xf32>
    %55 = vector.shape_cast %54 : vector<1x1x512xf32> to vector<1x512xf32>
    %c1_9 = arith.constant 1 : index
    %c0_10 = arith.constant 0 : index
    %c0_11 = arith.constant 0 : index
    %56 = vector.load %arg3[%c1_9, %c0_10, %c0_11] : memref<3x1x512xf32, #tpu.memory_space<vmem>>, vector<1x1x512xf32>
    %57 = vector.shape_cast %56 : vector<1x1x512xf32> to vector<1x512xf32>
    %c2_12 = arith.constant 2 : index
    %c0_13 = arith.constant 0 : index
    %c0_14 = arith.constant 0 : index
    %58 = vector.load %arg3[%c2_12, %c0_13, %c0_14] : memref<3x1x512xf32, #tpu.memory_space<vmem>>, vector<1x1x512xf32>
    %59 = vector.shape_cast %58 : vector<1x1x512xf32> to vector<1x512xf32>
    %60 = vector.broadcast %16 : f32 to vector<1x512xf32>
    %61 = arith.mulf %60, %55 : vector<1x512xf32>
    %62 = vector.broadcast %20 : f32 to vector<1x512xf32>
    %63 = arith.mulf %62, %57 : vector<1x512xf32>
    %64 = arith.addf %61, %63 : vector<1x512xf32>
    %65 = vector.broadcast %24 : f32 to vector<1x512xf32>
    %66 = arith.mulf %65, %59 : vector<1x512xf32>
    %67 = arith.addf %64, %66 : vector<1x512xf32>
    %68 = vector.broadcast %51 : f32 to vector<1x512xf32>
    %69 = arith.addf %67, %68 : vector<1x512xf32>
    %c0_15 = arith.constant 0 : index
    %c0_16 = arith.constant 0 : index
    %c0_17 = arith.constant 0 : index
    %70 = vector.load %arg4[%c0_15, %c0_16, %c0_17] : memref<3x1x512xf32, #tpu.memory_space<vmem>>, vector<1x1x512xf32>
    %71 = vector.shape_cast %70 : vector<1x1x512xf32> to vector<1x512xf32>
    %72 = vector.shape_cast %69 : vector<1x512xf32> to vector<1x1x512xf32>
    tpu.vector_store %arg4[%c0_15, %c0_16, %c0_17], %72 {strides = array<i32>} : memref<3x1x512xf32, #tpu.memory_space<vmem>>, vector<1x1x512xf32>,
    %73 = vector.broadcast %28 : f32 to vector<1x512xf32>
    %74 = arith.mulf %73, %55 : vector<1x512xf32>
    %75 = vector.broadcast %33 : f32 to vector<1x512xf32>
    %76 = arith.mulf %75, %57 : vector<1x512xf32>
    %77 = arith.addf %74, %76 : vector<1x512xf32>
    %78 = vector.broadcast %37 : f32 to vector<1x512xf32>
    %79 = arith.mulf %78, %59 : vector<1x512xf32>
    %80 = arith.addf %77, %79 : vector<1x512xf32>
    %81 = vector.broadcast %52 : f32 to vector<1x512xf32>
    %82 = arith.addf %80, %81 : vector<1x512xf32>
    %c1_18 = arith.constant 1 : index
    %c0_19 = arith.constant 0 : index
    %c0_20 = arith.constant 0 : index
    %83 = vector.load %arg4[%c1_18, %c0_19, %c0_20] : memref<3x1x512xf32, #tpu.memory_space<vmem>>, vector<1x1x512xf32>
    %84 = vector.shape_cast %83 : vector<1x1x512xf32> to vector<1x512xf32>
    %85 = vector.shape_cast %82 : vector<1x512xf32> to vector<1x1x512xf32>
    tpu.vector_store %arg4[%c1_18, %c0_19, %c0_20], %85 {strides = array<i32>} : memref<3x1x512xf32, #tpu.memory_space<vmem>>, vector<1x1x512xf32>,
    %86 = vector.broadcast %41 : f32 to vector<1x512xf32>
    %87 = arith.mulf %86, %55 : vector<1x512xf32>
    %88 = vector.broadcast %45 : f32 to vector<1x512xf32>
    %89 = arith.mulf %88, %57 : vector<1x512xf32>
    %90 = arith.addf %87, %89 : vector<1x512xf32>
    %91 = vector.broadcast %50 : f32 to vector<1x512xf32>
    %92 = arith.mulf %91, %59 : vector<1x512xf32>
    %93 = arith.addf %90, %92 : vector<1x512xf32>
    %94 = vector.broadcast %53 : f32 to vector<1x512xf32>
    %95 = arith.addf %93, %94 : vector<1x512xf32>
    %c2_21 = arith.constant 2 : index
    %c0_22 = arith.constant 0 : index
    %c0_23 = arith.constant 0 : index
    %96 = vector.load %arg4[%c2_21, %c0_22, %c0_23] : memref<3x1x512xf32, #tpu.memory_space<vmem>>, vector<1x1x512xf32>
    %97 = vector.shape_cast %96 : vector<1x1x512xf32> to vector<1x512xf32>
    %98 = vector.shape_cast %95 : vector<1x512xf32> to vector<1x1x512xf32>
    tpu.vector_store %arg4[%c2_21, %c0_22, %c0_23], %98 {strides = array<i32>} : memref<3x1x512xf32, #tpu.memory_space<vmem>>, vector<1x1x512xf32>,
    return
  }
  func.func @transform_0(%arg0: i32) -> i32 {
    %c0_i32 = arith.constant 0 : i32
    %c0_i32_0 = arith.constant 0 : i32
    return %c0_i32 : i32
  }
  func.func @transform_1(%arg0: i32) -> i32 {
    %c0_i32 = arith.constant 0 : i32
    %c0_i32_0 = arith.constant 0 : i32
    return %c0_i32 : i32
  }
  func.func @transform_2(%arg0: i32) -> (i32, i32, i32) {
    %c0_i32 = arith.constant 0 : i32
    %c0_i32_0 = arith.constant 0 : i32
    %c0_i32_1 = arith.constant 0 : i32
    return %c0_i32, %arg0, %c0_i32_0 : i32, i32, i32
  }
  func.func @transform_3(%arg0: i32) -> (i32, i32, i32) {
    %c0_i32 = arith.constant 0 : i32
    %c0_i32_0 = arith.constant 0 : i32
    %c0_i32_1 = arith.constant 0 : i32
    return %c0_i32, %arg0, %c0_i32_0 : i32, i32, i32
  }
}

</mosaic_0001>

<bundles_post_ra>
// kernel: _point_cloud_alignment_impl.1
= control target key start
LH: loop header
LB: loop body
LE: loop exit
PB: predicated region body
PF: predicated region fallthrough
CT: control target
= control target key end

     0   :  { %8 = vsyncpa [#allocation3], 0  ;;  %s270_s0 = inlined_call_operand.vmem [shape: f32[4], index: 0, kind: input, shape index: {}]   ;;  %s271_s1 = inlined_call_operand.vmem [shape: f32[3], index: 1, kind: input, shape index: {}]   ;;  %s272_s2 = inlined_call_operand.vmem [shape: f32[3,1,512], index: 2, kind: input, shape index: {}]   ;;  %s273_s3 = inlined_call_operand.vmem [shape: f32[3,1,512], index: 3, kind: output, shape index: {}]  }
   0x1   :  { %s16_s14 = sshll.u32 %s270_s0, 4  ;;  %s17_s14 = int_to_ptr.vmem [resolvable:$true] %s16_s14 }
   0x2   :  { %9 = vsyncpa [#allocation5], 0  ;;  %s26_s17 = sshll.u32 %s271_s1, 4  ;;  %s149_s18 = scalar_lea.vmem %s17_s14, 16  ;;  %s27_s17 = int_to_ptr.vmem [resolvable:$true] %s26_s17 }
   0x3   :  { %p150_p0 = scmp.ne.s32.totalorder %s17_s14, %s149_s18  ;;  %p154_p1 = scmp.lt.s32.totalorder %s17_s14, %s17_s14 }
   0x4   :  { %p155_p2 = scmp.lt.s32.totalorder %s149_s18, %s149_s18 }
   0x6   :  { %p156_p3 = por %p155_p2, %p154_p1 }
   0x8   :  { %p157_p4 = pnand %p156_p3, %p150_p0 }
   0xa   :  { %160 = shalt.err (!%p157_p4)
}
   0xb   :  { %s177_s19 = smov [#allocation2]   ;;  %s161_s20 = scalar_lea.vmem %s27_s17, 16 }
   0xc   :  { %19 = dma.vmem_to_smem %s17_s14, 16, %s177_s19, [#allocation3]  }
   0xd   :  { %p162_p5 = scmp.ne.s32.totalorder %s27_s17, %s161_s20  ;;  %p166_p6 = scmp.lt.s32.totalorder %s27_s17, %s27_s17 }
   0xe   :  { %p167_p7 = scmp.lt.s32.totalorder %s161_s20, %s161_s20 }
  0x10   :  { %p168_p8 = por %p167_p7, %p166_p6 }
  0x12   :  { %p169_p9 = pnand %p168_p8, %p162_p5 }
  0x14   :  { %172 = shalt.err (!%p169_p9)
}
  0x15   :  { %s178_s0 = smov [#allocation4]  }
  0x16   :  { %29 = dma.vmem_to_smem %s27_s17, 16, %s178_s0, [#allocation5]  }
  0x17   :  { %173 = dma.done.wait [#allocation3], 16  }
  0x18   :  { %174 = vsyncadd [#allocation3], 4294967280 }
  0x19   :  { %175 = dma.done.wait [#allocation5], 16  }
  0x1a   :  { %176 = vsyncadd [#allocation5], 4294967280 }
  0x1b   :  { %38 = sfence }
  0x1c   :  { %s39_s1 = sld [smem:[#allocation2]]  ;;  %s134_s21 = sld [smem:[#allocation2 + $0x1]]  ;;  %v139_v2 = vld [vmem:[%s272_s2 + $0x4] sm:$0xf]  ;;  %v84_v4 = vld [vmem:[%s272_s2] sm:$0xf]  ;;  %v99_v14 = vlaneseq }
  0x1d   :  { %s135_s22 = sld [smem:[#allocation2 + $0x2]]  ;;  %s136_s23 = sld [smem:[#allocation2 + $0x3]]  ;;  %v140_v5 = vld [vmem:[%s272_s2 + $0x8] sm:$0xf] }
  0x1e   :  { %s240_s0 = sld [smem:[#allocation4]]  ;;  %vm101_vm0 = vcmp.lt.s32.totalorder %v99_v14, 512 }
  0x22   :  { %s43_s24 = smul.f32 %s39_s1, %s39_s1 }
  0x23   :  { %s205_s25 = smul.f32 %s134_s21, %s134_s21 }
  0x24   :  { %s207_s26 = smul.f32 %s135_s22, %s135_s22  ;;  %v97_v13 = vstv %s240_s0 }
  0x25   :  { %s45_s27 = sadd.f32 %s205_s25, %s43_s24  ;;  %s210_s28 = smul.f32 %s136_s23, %s136_s23 }
  0x26   :  { %s78_s29 = sadd.f32 %s207_s26, %s205_s25  ;;  %s214_s30 = smul.f32 %s135_s22, %s134_s21 }
  0x27   :  { %s47_s4 = sadd.f32 %s207_s26, %s45_s27  ;;  %s58_s5 = smul.f32 %s136_s23, %s39_s1 }
  0x28   :  { %s54_s6 = sadd.f32 %s210_s28, %s207_s26  ;;  %s219_s7 = smul.f32 %s136_s23, %s134_s21 }
  0x29   :  { %s49_s8 = sadd.f32 %s210_s28, %s47_s4  ;;  %s222_s9 = smul.f32 %s135_s22, %s39_s1 }
  0x2a   :  { %s67_s10 = sadd.f32 %s210_s28, %s205_s25  ;;  %s226_s11 = smul.f32 %s136_s23, %s135_s22 }
  0x2b   :  { %v50_v0 = vstv %s49_s8  ;;  %s59_s12 = ssub.f32 %s214_s30, %s58_s5  ;;  %s229_s13 = smul.f32 %s134_s21, %s39_s1 }
  0x2c   :  { %147 = vrcp.f32 %v50_v0  ;;  %s63_s14 = sadd.f32 %s222_s9, %s219_s7  ;;  %s245_s4 = sld [smem:[#allocation4 + $0x1]] }
  0x2d   :  { %s65_s15 = sadd.f32 %s58_s5, %s214_s30 }
  0x2e   :  { %s72_s16 = ssub.f32 %s226_s11, %s229_s13 }
  0x2f   :  { %s74_s17 = ssub.f32 %s219_s7, %s222_s9 }
  0x30   :  { %s76_s18 = sadd.f32 %s229_s13, %s226_s11  ;;  %s253_s11 = sld [smem:[#allocation4 + $0x2]] }
  0x32   :  { %v112_v27 = vstv %s245_s4 }
  0x36   :  { %v148_v1 = vpop.eup %147  ;;  %v124_v32 = vstv %s253_s11 }
  0x37   :  { %143 = vpush %v148_v1 }
  0x68   :  { %s144_s19 = spop %143 }
  0x69   :  { %s53_s20 = smul.f32 2.0, %s144_s19 }
  0x6b   :  { %s55_s22 = smul.f32 %s54_s6, %s53_s20 }
  0x6c   :  { %s60_s23 = smul.f32 %s59_s12, %s53_s20 }
  0x6d   :  { %s56_s24 = ssub.f32 1.0, %s55_s22  ;;  %s64_s27 = smul.f32 %s63_s14, %s53_s20 }
  0x6e   :  { %s66_s28 = smul.f32 %s65_s15, %s53_s20  ;;  %v91_v3 = vstv %s60_s23 }
  0x6f   :  { %s68_s30 = smul.f32 %s67_s10, %s53_s20  ;;  %v89_v6 = vstv %s56_s24  ;;  %v94_v7 = vstv %s64_s27  ;;  %v92_v9 = vmul.f32 %v139_v2, %v91_v3 }
  0x70   :  { %s73_s6 = smul.f32 %s72_s16, %s53_s20  ;;  %v90_v8 = vmul.f32 %v89_v6, %v84_v4  ;;  %v104_v10 = vstv %s66_s28  ;;  %v95_v12 = vmul.f32 %v140_v5, %v94_v7 }
  0x71   :  { %s69_s10 = ssub.f32 1.0, %s68_s30  ;;  %s75_s12 = smul.f32 %s74_s17, %s53_s20  ;;  %v105_v15 = vmul.f32 %v104_v10, %v84_v4 }
  0x72   :  { %s77_s13 = smul.f32 %s76_s18, %s53_s20  ;;  %v93_v11 = vadd.f32 %v92_v9, %v90_v8  ;;  %v109_v17 = vstv %s73_s6 }
  0x73   :  { %s79_s14 = smul.f32 %s78_s29, %s53_s20  ;;  %v106_v16 = vstv %s69_s10  ;;  %v116_v18 = vstv %s75_s12  ;;  %v110_v26 = vmul.f32 %v140_v5, %v109_v17 }
  0x74   :  { %v96_v19 = vadd.f32 %v95_v12, %v93_v11  ;;  %v107_v20 = vmul.f32 %v139_v2, %v106_v16  ;;  %v117_v21 = vmul.f32 %v116_v18, %v84_v4  ;;  %v118_v22 = vstv %s77_s13 }
  0x75   :  { %s80_s2 = ssub.f32 1.0, %s79_s14  ;;  %v119_v23 = vmul.f32 %v139_v2, %v118_v22 }
  0x76   :  { %v98_v24 = vadd.f32 %v97_v13, %v96_v19  ;;  %v108_v25 = vadd.f32 %v107_v20, %v105_v15 }
  0x77   :  { %v120_v28 = vadd.f32 %v119_v23, %v117_v21  ;;  %v121_v29 = vstv %s80_s2 }
  0x78   :  { %103 = vst.msk [vmem:[%s273_s3] sm:$0xf] %vm101_vm0, %v98_v24  ;;  %v111_v30 = vadd.f32 %v110_v26, %v108_v25  ;;  %v122_v31 = vmul.f32 %v140_v5, %v121_v29 }
  0x7a   :  { %v113_v33 = vadd.f32 %v112_v27, %v111_v30  ;;  %v123_v34 = vadd.f32 %v122_v31, %v120_v28 }
  0x7c   :  { %141 = vst.msk [vmem:[%s273_s3 + $0x4] sm:$0xf] %vm101_vm0, %v113_v33  ;;  %v125_v35 = vadd.f32 %v124_v32, %v123_v34 }
  0x7e   :  { %142 = vst.msk [vmem:[%s273_s3 + $0x8] sm:$0xf] %vm101_vm0, %v125_v35 }
  0x7f   :  { %132 = vsyncpa [#allocation3], 1 }
  0x80   :  { %133 = vsyncpa [#allocation5], 1 }

</bundles_post_ra>
